<compile_context>
chip_gen: v6e
topology: v6e:2x2x1
jax: 0.10.0
libtpu: 0.0.40
codegen_flags: <defaults>
</compile_context>

<pallas_src>
import functools

import jax
import jax.numpy as jnp
from jax.experimental import pallas as pl
from jax.experimental.pallas import tpu as pltpu

D_IN, D_HID, D_OUT = 1024, 512, 10
D_OUT_PAD = 128  # lane-dense fc2 output width (multiple of 128)


def mlp_kernel(x_ref, w1_ref, b1_ref, w2_ref, b2_ref, o_ref):
    # fc1: [TB,1024]bf16 @ [1024,512]bf16 -> f32 accumulate, + bias, ReLU.
    h = jnp.dot(x_ref[...], w1_ref[...], preferred_element_type=jnp.float32)
    h = jnp.maximum(h + b1_ref[...], 0.0)
    # fc2: bf16 handoff for the MXU, f32 accumulate, lane-dense (128) output.
    y = jnp.dot(h.astype(jnp.bfloat16), w2_ref[...],
                preferred_element_type=jnp.float32)
    o_ref[...] = (y + b2_ref[...]).astype(o_ref.dtype)


@functools.partial(jax.jit, static_argnames=("tb",))
def simple_model_forward(x, w1, b1, w2p, b2p, *, tb=512):
    """x: [B,1024] bf16; w1: [1024,512] bf16; b1: [1,512] f32;
       w2p: [512,128] bf16 (zero-padded cols 10:); b2p: [1,128] f32.
       Returns [B,10] f32 logits (matches nn.Linear->ReLU->nn.Linear)."""
    B = x.shape[0]
    # Batch tile: 512 rows keeps the MXU M dim full and amortizes per-step
    # pipeline overhead; small batches collapse to a single tile rounded up
    # to the 8-sublane granule.
    TB = tb if B >= tb else max(8, ((B + 7) // 8) * 8)
    Bp = pl.cdiv(B, TB) * TB
    if Bp != B:
        x = jnp.pad(x, ((0, Bp - B), (0, 0)))

    flops = 2 * Bp * (D_IN * D_HID + D_HID * D_OUT_PAD)
    bytes_accessed = (
        Bp * D_IN * 2                      # x stream (bf16)
        + D_IN * D_HID * 2                 # w1 (bf16, resident)
        + D_HID * D_OUT_PAD * 2            # w2 (bf16, resident)
        + (D_HID + D_OUT_PAD) * 4          # biases (f32)
        + Bp * D_OUT_PAD * 4               # output writeback (f32)
    )

    out = pl.pallas_call(
        mlp_kernel,
        out_shape=jax.ShapeDtypeStruct((Bp, D_OUT_PAD), jnp.float32),
        grid_spec=pltpu.PrefetchScalarGridSpec(
            num_scalar_prefetch=0,
            grid=(Bp // TB,),
            in_specs=[
                pl.BlockSpec((TB, D_IN), lambda i: (i, 0)),          # x streams
                pl.BlockSpec((D_IN, D_HID), lambda i: (0, 0)),       # w1 resident
                pl.BlockSpec((1, D_HID), lambda i: (0, 0)),          # b1 resident
                pl.BlockSpec((D_HID, D_OUT_PAD), lambda i: (0, 0)),  # w2 resident
                pl.BlockSpec((1, D_OUT_PAD), lambda i: (0, 0)),      # b2 resident
            ],
            out_specs=pl.BlockSpec((TB, D_OUT_PAD), lambda i: (i, 0)),
        ),
        compiler_params=pltpu.CompilerParams(
            dimension_semantics=("parallel",)),
        cost_estimate=pl.CostEstimate(
            flops=flops, transcendentals=0, bytes_accessed=bytes_accessed),
    )(x, w1, b1, w2p, b2p)
    return out[:B, :D_OUT]


def init_params(key):
    # Mirror nn.Linear default init: U(-1/sqrt(fan_in), 1/sqrt(fan_in)).
    k1, k2, k3, k4 = jax.random.split(key, 4)
    bound1 = 1.0 / jnp.sqrt(1024.0)
    bound2 = 1.0 / jnp.sqrt(512.0)
    # Weights stored transposed to [in, out] so the kernel does x @ W + b.
    w1 = jax.random.uniform(k1, (D_IN, D_HID), jnp.float32, -bound1, bound1)
    b1 = jax.random.uniform(k2, (1, D_HID), jnp.float32, -bound1, bound1)
    w2 = jax.random.uniform(k3, (D_HID, D_OUT), jnp.float32, -bound2, bound2)
    b2 = jax.random.uniform(k4, (1, D_OUT), jnp.float32, -bound2, bound2)
    # bf16 weights (halved DMA, native MXU path); zero-pad fc2 to 128 lanes.
    w1_bf = w1.astype(jnp.bfloat16)
    w2p = jnp.zeros((D_HID, D_OUT_PAD), jnp.bfloat16).at[:, :D_OUT].set(
        w2.astype(jnp.bfloat16))
    b2p = jnp.zeros((1, D_OUT_PAD), jnp.float32).at[:, :D_OUT].set(b2)
    return w1_bf, b1, w2p, b2p


if __name__ == "__main__":
    key = jax.random.PRNGKey(0)
    pkey, xkey = jax.random.split(key)
    w1, b1, w2p, b2p = init_params(pkey)

    B = 8
    x = jax.random.normal(xkey, (B, D_IN), jnp.float32).astype(jnp.bfloat16)

    out = simple_model_forward(x, w1, b1, w2p, b2p)
    out = jax.block_until_ready(out)

    # Reference in plain JAX, mirroring kernel precision
    # (bf16-quantized inputs/weights, f32 accumulation, bf16 activation handoff).
    x32 = x.astype(jnp.float32)
    w1_32 = w1.astype(jnp.float32)
    w2_32 = w2p[:, :D_OUT].astype(jnp.float32)
    h_ref = jnp.maximum(x32 @ w1_32 + b1, 0.0)
    h_ref = h_ref.astype(jnp.bfloat16).astype(jnp.float32)
    ref = h_ref @ w2_32 + b2p[:, :D_OUT]

    assert out.shape == (B, D_OUT)
    assert out.dtype == jnp.float32
    assert jnp.allclose(out, ref, atol=1e-2, rtol=1e-2)
    print("KERNEL_OK")
</pallas_src>

<mosaic_0001>
module attributes {stable_mosaic.version = 11 : i64} {
  func.func @mlp_kernel(%arg0: i32, %arg1: memref<8x1024xbf16, #tpu.memory_space<vmem>>, %arg2: memref<1024x512xbf16, #tpu.memory_space<vmem>>, %arg3: memref<1x512xf32, #tpu.memory_space<vmem>>, %arg4: memref<512x128xbf16, #tpu.memory_space<vmem>>, %arg5: memref<1x128xf32, #tpu.memory_space<vmem>>, %arg6: memref<8x128xf32, #tpu.memory_space<vmem>>) attributes {dimension_semantics = [#tpu.dimension_semantics<parallel>], iteration_bounds = array<i64: 1>, scalar_prefetch = 0 : i64, scratch_operands = 0 : i64, tpu.core_type = #tpu.core_type<tc>, window_params = [{transform_indices = @transform_0, window_bounds = array<i64: 8, 1024>}, {pipeline_mode = #tpu.pipeline_mode<synchronous>, transform_indices = @transform_1, window_bounds = array<i64: 1024, 512>}, {pipeline_mode = #tpu.pipeline_mode<synchronous>, transform_indices = @transform_2, window_bounds = array<i64: 1, 512>}, {pipeline_mode = #tpu.pipeline_mode<synchronous>, transform_indices = @transform_3, window_bounds = array<i64: 512, 128>}, {pipeline_mode = #tpu.pipeline_mode<synchronous>, transform_indices = @transform_4, window_bounds = array<i64: 1, 128>}, {transform_indices = @transform_5, window_bounds = array<i64: 8, 128>}]} {
    %c0 = arith.constant 0 : index
    %c0_0 = arith.constant 0 : index
    %0 = vector.load %arg1[%c0, %c0_0] : memref<8x1024xbf16, #tpu.memory_space<vmem>>, vector<8x1024xbf16>
    %c0_1 = arith.constant 0 : index
    %c0_2 = arith.constant 0 : index
    %1 = vector.load %arg2[%c0_1, %c0_2] : memref<1024x512xbf16, #tpu.memory_space<vmem>>, vector<1024x512xbf16>
    %cst = arith.constant dense<0.000000e+00> : vector<8x512xf32>
    %2 = tpu.matmul %0, %1, %cst {dimension_numbers = #tpu.dot_dimension_numbers<[1], [0], [0], [1], [0, 0, 1, 1], [], []>} : vector<8x1024xbf16>, vector<1024x512xbf16>, vector<8x512xf32> -> vector<8x512xf32>
    %c0_3 = arith.constant 0 : index
    %c0_4 = arith.constant 0 : index
    %3 = vector.load %arg3[%c0_3, %c0_4] : memref<1x512xf32, #tpu.memory_space<vmem>>, vector<1x512xf32>
    %4 = vector.broadcast %3 : vector<1x512xf32> to vector<8x512xf32>
    %5 = arith.addf %2, %4 : vector<8x512xf32>
    %cst_5 = arith.constant 0.000000e+00 : f32
    %6 = vector.broadcast %cst_5 : f32 to vector<8x512xf32>
    %7 = arith.maximumf %5, %6 : vector<8x512xf32>
    %8 = arith.truncf %7 : vector<8x512xf32> to vector<8x512xbf16>
    %c0_6 = arith.constant 0 : index
    %c0_7 = arith.constant 0 : index
    %9 = vector.load %arg4[%c0_6, %c0_7] : memref<512x128xbf16, #tpu.memory_space<vmem>>, vector<512x128xbf16>
    %cst_8 = arith.constant dense<0.000000e+00> : vector<8x128xf32>
    %10 = tpu.matmul %8, %9, %cst_8 {dimension_numbers = #tpu.dot_dimension_numbers<[1], [0], [0], [1], [0, 0, 1, 1], [], []>} : vector<8x512xbf16>, vector<512x128xbf16>, vector<8x128xf32> -> vector<8x128xf32>
    %c0_9 = arith.constant 0 : index
    %c0_10 = arith.constant 0 : index
    %11 = vector.load %arg5[%c0_9, %c0_10] : memref<1x128xf32, #tpu.memory_space<vmem>>, vector<1x128xf32>
    %12 = vector.broadcast %11 : vector<1x128xf32> to vector<8x128xf32>
    %13 = arith.addf %10, %12 : vector<8x128xf32>
    %c0_11 = arith.constant 0 : index
    %c0_12 = arith.constant 0 : index
    %14 = vector.load %arg6[%c0_11, %c0_12] : memref<8x128xf32, #tpu.memory_space<vmem>>, vector<8x128xf32>
    tpu.vector_store %arg6[%c0_11, %c0_12], %13 {strides = array<i32>} : memref<8x128xf32, #tpu.memory_space<vmem>>, vector<8x128xf32>,
    return
  }
  func.func @transform_0(%arg0: i32) -> (i32, i32) {
    %c0_i32 = arith.constant 0 : i32
    %c0_i32_0 = arith.constant 0 : i32
    return %arg0, %c0_i32 : i32, i32
  }
  func.func @transform_1(%arg0: i32) -> (i32, i32) {
    %c0_i32 = arith.constant 0 : i32
    %c0_i32_0 = arith.constant 0 : i32
    %c0_i32_1 = arith.constant 0 : i32
    return %c0_i32, %c0_i32_0 : i32, i32
  }
  func.func @transform_2(%arg0: i32) -> (i32, i32) {
    %c0_i32 = arith.constant 0 : i32
    %c0_i32_0 = arith.constant 0 : i32
    %c0_i32_1 = arith.constant 0 : i32
    return %c0_i32, %c0_i32_0 : i32, i32
  }
  func.func @transform_3(%arg0: i32) -> (i32, i32) {
    %c0_i32 = arith.constant 0 : i32
    %c0_i32_0 = arith.constant 0 : i32
    %c0_i32_1 = arith.constant 0 : i32
    return %c0_i32, %c0_i32_0 : i32, i32
  }
  func.func @transform_4(%arg0: i32) -> (i32, i32) {
    %c0_i32 = arith.constant 0 : i32
    %c0_i32_0 = arith.constant 0 : i32
    %c0_i32_1 = arith.constant 0 : i32
    return %c0_i32, %c0_i32_0 : i32, i32
  }
  func.func @transform_5(%arg0: i32) -> (i32, i32) {
    %c0_i32 = arith.constant 0 : i32
    %c0_i32_0 = arith.constant 0 : i32
    return %arg0, %c0_i32 : i32, i32
  }
}

</mosaic_0001>

<bundles_post_ra>
// kernel: simple_model_forward.1
= control target key start
LH: loop header
LB: loop body
LE: loop exit
PB: predicated region body
PF: predicated region fallthrough
CT: control target
= control target key end

     0   :  { %10 = vsyncpa [#allocation3], 0  ;;  %s3352_s0 = inlined_call_operand.hbm [shape: bf16[8,1024], index: 0, kind: input, shape index: {}]   ;;  %s3353_s1 = inlined_call_operand.hbm [shape: bf16[1024,512], index: 1, kind: input, shape index: {}]   ;;  %s3354_s2 = inlined_call_operand.hbm [shape: f32[1,512], index: 2, kind: input, shape index: {}]   ;;  %s3355_s3 = inlined_call_operand.hbm [shape: bf16[512,128], index: 3, kind: input, shape index: {}]   ;;  %s3356_s4 = inlined_call_operand.vmem [shape: f32[1,128], index: 4, kind: input, shape index: {}]   ;;  %s3357_s5 = inlined_call_operand.hbm [shape: f32[8,128], index: 5, kind: output, shape index: {}]  }
   0x1   :  { %11 = vsyncpa [#allocation6], 0 }
   0x2   :  { %12 = vsyncpa [#allocation9], 0 }
   0x3   :  { %13 = vsyncpa [#allocation4], 0  ;;  %s3242_s18 = smov [#allocation5]  }
   0x4   :  { %s29_s19 = sshll.u32 %s3242_s18, 4  ;;  %s30_s19 = int_to_ptr.vmem [resolvable:$true] %s29_s19 }
   0x5   :  { %s3142_s20 = scalar_lea.vmem %s30_s19, 32768  ;;  %p3147_p1 = scmp.lt.s32.totalorder %s30_s19, %s30_s19 }
   0x6   :  { %p3143_p0 = scmp.ne.s32.totalorder %s30_s19, %s3142_s20  ;;  %p3148_p2 = scmp.lt.s32.totalorder %s3142_s20, %s3142_s20 }
   0x8   :  { %p3149_p3 = por %p3148_p2, %p3147_p1 }
   0xa   :  { %p3150_p4 = pnand %p3149_p3, %p3143_p0 }
   0xc   :  { %3153 = shalt.err (!%p3150_p4)
}
   0xd   :  { %s3243_s21 = smov 256   ;;  %s3244_s22 = smov 16  }
   0xe   :  { %35 = dma.hbm_to_vmem [thread:$0]  %s3353_s1, 32768, %s30_s19, [#allocation6], %s3243_s21, %s3243_s21, %s3244_s22  }
   0xf   :  { %s3245_s25 = smov [#allocation2]   ;;  %s3246_s27 = smov [#allocation7]  }
  0x10   :  { %s20_s26 = sshll.u32 %s3245_s25, 4  ;;  %s42_s28 = sshll.u32 %s3246_s27, 4  ;;  %s21_s26 = int_to_ptr.vmem [resolvable:$true] %s20_s26  ;;  %s43_s28 = int_to_ptr.vmem [resolvable:$true] %s42_s28 }
  0x11   :  { %s3162_s29 = scalar_lea.vmem %s21_s26, 512  ;;  %p3167_p6 = scmp.lt.s32.totalorder %s21_s26, %s21_s26 }
  0x12   :  { %p3163_p5 = scmp.ne.s32.totalorder %s21_s26, %s3162_s29  ;;  %p3168_p7 = scmp.lt.s32.totalorder %s3162_s29, %s3162_s29 }
  0x14   :  { %p3169_p8 = por %p3168_p7, %p3167_p6 }
  0x16   :  { %p3170_p9 = pnand %p3169_p8, %p3163_p5 }
  0x18   :  { %3173 = shalt.err (!%p3170_p9)
}
  0x19   :  { %23 = dma.hbm_to_vmem [thread:$0]  %s3352_s0, 512, %s21_s26, [#allocation3]  }
  0x1a   :  { %s3182_s7 = scalar_lea.vmem %s43_s28, 64  ;;  %p3187_p11 = scmp.lt.s32.totalorder %s43_s28, %s43_s28 }
  0x1b   :  { %p3183_p10 = scmp.ne.s32.totalorder %s43_s28, %s3182_s7  ;;  %p3188_p12 = scmp.lt.s32.totalorder %s3182_s7, %s3182_s7 }
  0x1d   :  { %p3189_p13 = por %p3188_p12, %p3187_p11 }
  0x1f   :  { %p3190_p0 = pnand %p3189_p13, %p3183_p10 }
  0x21   :  { %3193 = shalt.err (!%p3190_p0)
}
  0x22   :  { %45 = dma.hbm_to_vmem [thread:$0]  %s3354_s2, 64, %s43_s28, [#allocation6]  }
  0x23   :  { %s3247_s9 = smov [#allocation8]  }
  0x24   :  { %s51_s10 = sshll.u32 %s3247_s9, 4  ;;  %s52_s10 = int_to_ptr.vmem [resolvable:$true] %s51_s10 }
  0x25   :  { %s3202_s11 = scalar_lea.vmem %s52_s10, 4096  ;;  %p3207_p2 = scmp.lt.s32.totalorder %s52_s10, %s52_s10 }
  0x26   :  { %p3203_p1 = scmp.ne.s32.totalorder %s52_s10, %s3202_s11  ;;  %p3208_p3 = scmp.lt.s32.totalorder %s3202_s11, %s3202_s11 }
  0x28   :  { %p3209_p4 = por %p3208_p3, %p3207_p2 }
  0x2a   :  { %p3210_p5 = pnand %p3209_p4, %p3203_p1 }
  0x2c   :  { %3213 = shalt.err (!%p3210_p5)
}
  0x2d   :  { %s3248_s0 = smov 64   ;;  %s3249_s12 = smov 4  }
  0x2e   :  { %57 = dma.hbm_to_vmem [thread:$0]  %s3355_s3, 4096, %s52_s10, [#allocation9], %s3248_s0, %s3248_s0, %s3249_s12  }
  0x2f   :  { %3234 = dma.done.wait [#allocation3], 512  }
  0x30   :  { %3235 = vsyncadd [#allocation3], 4294966784 }
  0x31   :  { %3236 = dma.done.wait [#allocation6], 32832  }
  0x32   :  { %3237 = vsyncadd [#allocation6], 4294934464 }
  0x33   :  { %3238 = dma.done.wait [#allocation9], 4096  }
  0x34   :  { %3239 = vsyncadd [#allocation9], 4294963200  ;;  %v2710_v0 = vld [vmem:[#allocation5 + $0xe4] ss:$16 sps:$4 sm:$0xff]   ;;  %v2714_v2 = vld [vmem:[#allocation5 + $0xe0] ss:$16 sps:$4 sm:$0xff]  }
  0x35   :  { %v2712_v1 = vld [vmem:[#allocation5 + $0x2e4] ss:$16 sps:$4 sm:$0xff]   ;;  %1663 = vmatprep.subr.bf16.mxu0 %v2710_v0  ;;  %v2715_v3 = vld [vmem:[#allocation5 + $0x2e0] ss:$16 sps:$4 sm:$0xff]   ;;  %v74_v48 = vld [vmem:[#allocation2 + $0x8] sm:$0xff]  ;;  %s3250_s15 = smov [#allocation10]  }
  0x36   :  { %1704 = vmatprep.subr.bf16.mxu1 %v2712_v1  ;;  %v2716_v4 = vld [vmem:[#allocation5 + $0xc4] ss:$16 sps:$4 sm:$0xff]   ;;  %1664 = vmatpush1.bf16.msra.mxu0 %v2714_v2  ;;  %v2720_v6 = vld [vmem:[#allocation5 + $0xc0] ss:$16 sps:$4 sm:$0xff]   ;;  %v3295_v51 = vcombine.high %v74_v48, %v74_v48  ;;  %s2349_s16 = sshll.u32 %s3250_s15, 4  ;;  %s2350_s16 = int_to_ptr.vmem [resolvable:$true] %s2349_s16 }
  0x37   :  { %1705 = vmatpush1.bf16.msra.mxu1 %v2715_v3  ;;  %v2718_v5 = vld [vmem:[#allocation5 + $0x2c4] ss:$16 sps:$4 sm:$0xff]   ;;  %1665 = vmatprep.subr.bf16.mxu0 %v2716_v4  ;;  %v2721_v7 = vld [vmem:[#allocation5 + $0x2c0] ss:$16 sps:$4 sm:$0xff]   ;;  %s3214_s17 = scalar_lea.vmem %s2350_s16, 128  ;;  %p3219_p7 = scmp.lt.s32.totalorder %s2350_s16, %s2350_s16 }
  0x38   :  { %1706 = vmatprep.subr.bf16.mxu1 %v2718_v5  ;;  %v2722_v8 = vld [vmem:[#allocation5 + $0xa4] ss:$16 sps:$4 sm:$0xff]   ;;  %v2726_v10 = vld [vmem:[#allocation5 + $0xa0] ss:$16 sps:$4 sm:$0xff]   ;;  %1736 = vmatprep.mubr.bf16.mxu1 %v3295_v51  ;;  %p3215_p6 = scmp.ne.s32.totalorder %s2350_s16, %s3214_s17  ;;  %p3220_p8 = scmp.lt.s32.totalorder %s3214_s17, %s3214_s17 }
  0x39   :  { %v2724_v9 = vld [vmem:[#allocation5 + $0x2a4] ss:$16 sps:$4 sm:$0xff]   ;;  %v2727_v11 = vld [vmem:[#allocation5 + $0x2a0] ss:$16 sps:$4 sm:$0xff]  }
  0x3a   :  { %1666 = vmatpush1.bf16.msra.mxu0 %v2720_v6  ;;  %v2728_v12 = vld [vmem:[#allocation5 + $0x84] ss:$16 sps:$4 sm:$0xff]   ;;  %v2732_v14 = vld [vmem:[#allocation5 + $0x80] ss:$16 sps:$4 sm:$0xff]   ;;  %p3221_p9 = por %p3220_p8, %p3219_p7 }
  0x3b   :  { %1707 = vmatpush1.bf16.msra.mxu1 %v2721_v7  ;;  %1667 = vmatprep.subr.bf16.mxu0 %v2722_v8  ;;  %v2730_v13 = vld [vmem:[#allocation5 + $0x284] ss:$16 sps:$4 sm:$0xff]   ;;  %v2733_v15 = vld [vmem:[#allocation5 + $0x280] ss:$16 sps:$4 sm:$0xff]   ;;  %v3301_v7 = vcombine.low %v74_v48, %v74_v48 }
  0x3c   :  { %1708 = vmatprep.subr.bf16.mxu1 %v2724_v9  ;;  %v2734_v16 = vld [vmem:[#allocation5 + $0x64] ss:$16 sps:$4 sm:$0xff]   ;;  %v2738_v18 = vld [vmem:[#allocation5 + $0x60] ss:$16 sps:$4 sm:$0xff]   ;;  %p3222_p10 = pnand %p3221_p9, %p3215_p6 }
  0x3d   :  { %v2736_v17 = vld [vmem:[#allocation5 + $0x264] ss:$16 sps:$4 sm:$0xff]   ;;  %v2739_v19 = vld [vmem:[#allocation5 + $0x260] ss:$16 sps:$4 sm:$0xff]  }
  0x3e   :  { %1668 = vmatpush1.bf16.msra.mxu0 %v2726_v10  ;;  %v2740_v20 = vld [vmem:[#allocation5 + $0x44] ss:$16 sps:$4 sm:$0xff]   ;;  %v2744_v22 = vld [vmem:[#allocation5 + $0x40] ss:$16 sps:$4 sm:$0xff]  }
  0x3f   :  { %1709 = vmatpush1.bf16.msra.mxu1 %v2727_v11  ;;  %1669 = vmatprep.subr.bf16.mxu0 %v2728_v12  ;;  %v2742_v21 = vld [vmem:[#allocation5 + $0x244] ss:$16 sps:$4 sm:$0xff]   ;;  %v2745_v23 = vld [vmem:[#allocation5 + $0x240] ss:$16 sps:$4 sm:$0xff]  }
  0x40   :  { %1710 = vmatprep.subr.bf16.mxu1 %v2730_v13  ;;  %v2746_v24 = vld [vmem:[#allocation5 + $0x24] ss:$16 sps:$4 sm:$0xff]   ;;  %v2750_v26 = vld [vmem:[#allocation5 + $0x20] ss:$16 sps:$4 sm:$0xff]  }
  0x41   :  { %v2748_v25 = vld [vmem:[#allocation5 + $0x224] ss:$16 sps:$4 sm:$0xff]   ;;  %v2751_v27 = vld [vmem:[#allocation5 + $0x220] ss:$16 sps:$4 sm:$0xff]  }
  0x42   :  { %1670 = vmatpush1.bf16.msra.mxu0 %v2732_v14  ;;  %v2752_v28 = vld [vmem:[#allocation5 + $0x4] ss:$16 sps:$4 sm:$0xff]   ;;  %v2756_v30 = vld [vmem:[#allocation5] ss:$16 sps:$4 sm:$0xff]  }
  0x43   :  { %1711 = vmatpush1.bf16.msra.mxu1 %v2733_v15  ;;  %1671 = vmatprep.subr.bf16.mxu0 %v2734_v16  ;;  %v2754_v29 = vld [vmem:[#allocation5 + $0x204] ss:$16 sps:$4 sm:$0xff]   ;;  %v2757_v31 = vld [vmem:[#allocation5 + $0x200] ss:$16 sps:$4 sm:$0xff]  }
  0x44   :  { %1712 = vmatprep.subr.bf16.mxu1 %v2736_v17  ;;  %v2758_v32 = vld [vmem:[#allocation5 + $0x1e4] ss:$16 sps:$4 sm:$0xff]   ;;  %v2762_v34 = vld [vmem:[#allocation5 + $0x1e0] ss:$16 sps:$4 sm:$0xff]  }
  0x45   :  { %v2760_v33 = vld [vmem:[#allocation5 + $0x3e4] ss:$16 sps:$4 sm:$0xff]   ;;  %v2763_v35 = vld [vmem:[#allocation5 + $0x3e0] ss:$16 sps:$4 sm:$0xff]  }
  0x46   :  { %1672 = vmatpush1.bf16.msra.mxu0 %v2738_v18  ;;  %v2764_v36 = vld [vmem:[#allocation5 + $0x1c4] ss:$16 sps:$4 sm:$0xff]   ;;  %v2768_v38 = vld [vmem:[#allocation5 + $0x1c0] ss:$16 sps:$4 sm:$0xff]  }
  0x47   :  { %1713 = vmatpush1.bf16.msra.mxu1 %v2739_v19  ;;  %1673 = vmatprep.subr.bf16.mxu0 %v2740_v20  ;;  %v2766_v37 = vld [vmem:[#allocation5 + $0x3c4] ss:$16 sps:$4 sm:$0xff]   ;;  %v2769_v39 = vld [vmem:[#allocation5 + $0x3c0] ss:$16 sps:$4 sm:$0xff]  }
  0x48   :  { %1714 = vmatprep.subr.bf16.mxu1 %v2742_v21  ;;  %v2770_v40 = vld [vmem:[#allocation5 + $0x1a4] ss:$16 sps:$4 sm:$0xff]   ;;  %v2774_v42 = vld [vmem:[#allocation5 + $0x1a0] ss:$16 sps:$4 sm:$0xff]  }
  0x49   :  { %v2772_v41 = vld [vmem:[#allocation5 + $0x3a4] ss:$16 sps:$4 sm:$0xff]   ;;  %v2775_v43 = vld [vmem:[#allocation5 + $0x3a0] ss:$16 sps:$4 sm:$0xff]  }
  0x4a   :  { %1674 = vmatpush1.bf16.msra.mxu0 %v2744_v22  ;;  %v2776_v44 = vld [vmem:[#allocation5 + $0x184] ss:$16 sps:$4 sm:$0xff]   ;;  %v2780_v49 = vld [vmem:[#allocation5 + $0x180] ss:$16 sps:$4 sm:$0xff]  }
  0x4b   :  { %1715 = vmatpush1.bf16.msra.mxu1 %v2745_v23  ;;  %1675 = vmatprep.subr.bf16.mxu0 %v2746_v24  ;;  %v2778_v45 = vld [vmem:[#allocation5 + $0x384] ss:$16 sps:$4 sm:$0xff]   ;;  %v2781_v50 = vld [vmem:[#allocation5 + $0x380] ss:$16 sps:$4 sm:$0xff]  }
  0x4c   :  { %1716 = vmatprep.subr.bf16.mxu1 %v2748_v25  ;;  %v73_v46 = vld [vmem:[#allocation2] sm:$0xff] }
  0x4d   :  { %v3293_v47 = vcombine.high %v73_v46, %v73_v46  ;;  %v2782_v52 = vld [vmem:[#allocation5 + $0x164] ss:$16 sps:$4 sm:$0xff]   ;;  %v2786_v54 = vld [vmem:[#allocation5 + $0x160] ss:$16 sps:$4 sm:$0xff]   ;;  %v3299_v6 = vcombine.low %v73_v46, %v73_v46 }
  0x4e   :  { %1676 = vmatpush1.bf16.msra.mxu0 %v2750_v26  ;;  %v2784_v53 = vld [vmem:[#allocation5 + $0x364] ss:$16 sps:$4 sm:$0xff]   ;;  %v2787_v55 = vld [vmem:[#allocation5 + $0x360] ss:$16 sps:$4 sm:$0xff]  }
  0x4f   :  { %1717 = vmatpush1.bf16.msra.mxu1 %v2751_v27  ;;  %1677 = vmatprep.subr.bf16.mxu0 %v2752_v28  ;;  %v2788_v56 = vld [vmem:[#allocation5 + $0x144] ss:$16 sps:$4 sm:$0xff]   ;;  %v2792_v58 = vld [vmem:[#allocation5 + $0x140] ss:$16 sps:$4 sm:$0xff]  }
  0x50   :  { %1718 = vmatprep.subr.bf16.mxu1 %v2754_v29  ;;  %1695 = vmatprep.mubr.bf16.mxu0 %v3293_v47  ;;  %v2790_v57 = vld [vmem:[#allocation5 + $0x344] ss:$16 sps:$4 sm:$0xff]   ;;  %v2793_v59 = vld [vmem:[#allocation5 + $0x340] ss:$16 sps:$4 sm:$0xff]  }
  0x51   :  { %v2794_v60 = vld [vmem:[#allocation5 + $0x124] ss:$16 sps:$4 sm:$0xff]   ;;  %v2798_v62 = vld [vmem:[#allocation5 + $0x120] ss:$16 sps:$4 sm:$0xff]  }
  0x52   :  { %1678 = vmatpush1.bf16.msra.mxu0 %v2756_v30  ;;  %v2796_v61 = vld [vmem:[#allocation5 + $0x324] ss:$16 sps:$4 sm:$0xff]   ;;  %v2799_v63 = vld [vmem:[#allocation5 + $0x320] ss:$16 sps:$4 sm:$0xff]  }
  0x53   :  { %1719 = vmatpush1.bf16.msra.mxu1 %v2757_v31  ;;  %1679 = vmatprep.subr.bf16.mxu0 %v2758_v32  ;;  %v2800_v0 = vld [vmem:[#allocation5 + $0x104] ss:$16 sps:$4 sm:$0xff]   ;;  %v2804_v2 = vld [vmem:[#allocation5 + $0x100] ss:$16 sps:$4 sm:$0xff]  }
  0x54   :  { %1720 = vmatprep.subr.bf16.mxu1 %v2760_v33  ;;  %v2802_v1 = vld [vmem:[#allocation5 + $0x304] ss:$16 sps:$4 sm:$0xff]   ;;  %v2805_v3 = vld [vmem:[#allocation5 + $0x300] ss:$16 sps:$4 sm:$0xff]   ;;  %v3307_v33 = vld [vmem:[#allocation2 + $0x18] sm:$0xff] }
  0x55   :  { %v2812_v4 = vld [vmem:[#allocation5 + $0x4e4] ss:$16 sps:$4 sm:$0xff]   ;;  %v2810_v8 = vld [vmem:[#allocation5 + $0x4e0] ss:$16 sps:$4 sm:$0xff]  }
  0x56   :  { %1680 = vmatpush2.bf16.msra.mxu0 %v2762_v34  ;;  %v2815_v5 = vld [vmem:[#allocation5 + $0x6e4] ss:$16 sps:$4 sm:$0xff]   ;;  %v2813_v9 = vld [vmem:[#allocation5 + $0x6e0] ss:$16 sps:$4 sm:$0xff]  }
  0x57   :  { %1721 = vmatpush2.bf16.msra.mxu1 %v2763_v35  ;;  %1681 = vmatprep.subr.bf16.mxu0 %v2764_v36  ;;  %v2818_v10 = vld [vmem:[#allocation5 + $0x4c4] ss:$16 sps:$4 sm:$0xff]   ;;  %v2816_v12 = vld [vmem:[#allocation5 + $0x4c0] ss:$16 sps:$4 sm:$0xff]  }
  0x58   :  { %1722 = vmatprep.subr.bf16.mxu1 %v2766_v37  ;;  %v2821_v11 = vld [vmem:[#allocation5 + $0x6c4] ss:$16 sps:$4 sm:$0xff]   ;;  %v2819_v13 = vld [vmem:[#allocation5 + $0x6c0] ss:$16 sps:$4 sm:$0xff]   ;;  %v3315_v37 = vcombine.high %v3307_v33, %v3307_v33 }
  0x59   :  { %v2824_v14 = vld [vmem:[#allocation5 + $0x4a4] ss:$16 sps:$4 sm:$0xff]   ;;  %v2822_v16 = vld [vmem:[#allocation5 + $0x4a0] ss:$16 sps:$4 sm:$0xff]  }
  0x5a   :  { %1682 = vmatpush2.bf16.msra.mxu0 %v2768_v38  ;;  %v2827_v15 = vld [vmem:[#allocation5 + $0x6a4] ss:$16 sps:$4 sm:$0xff]   ;;  %v2825_v17 = vld [vmem:[#allocation5 + $0x6a0] ss:$16 sps:$4 sm:$0xff]  }
  0x5b   :  { %1723 = vmatpush2.bf16.msra.mxu1 %v2769_v39  ;;  %1683 = vmatprep.subr.bf16.mxu0 %v2770_v40  ;;  %v2830_v18 = vld [vmem:[#allocation5 + $0x484] ss:$16 sps:$4 sm:$0xff]   ;;  %v2828_v20 = vld [vmem:[#allocation5 + $0x480] ss:$16 sps:$4 sm:$0xff]  }
  0x5c   :  { %1724 = vmatprep.subr.bf16.mxu1 %v2772_v41  ;;  %v2833_v19 = vld [vmem:[#allocation5 + $0x684] ss:$16 sps:$4 sm:$0xff]   ;;  %v2831_v21 = vld [vmem:[#allocation5 + $0x680] ss:$16 sps:$4 sm:$0xff]  }
  0x5d   :  { %v2836_v22 = vld [vmem:[#allocation5 + $0x464] ss:$16 sps:$4 sm:$0xff]   ;;  %v2834_v24 = vld [vmem:[#allocation5 + $0x460] ss:$16 sps:$4 sm:$0xff]  }
  0x5e   :  { %1684 = vmatpush2.bf16.msra.mxu0 %v2774_v42  ;;  %v2839_v23 = vld [vmem:[#allocation5 + $0x664] ss:$16 sps:$4 sm:$0xff]   ;;  %v2837_v25 = vld [vmem:[#allocation5 + $0x660] ss:$16 sps:$4 sm:$0xff]  }
  0x5f   :  { %1725 = vmatpush2.bf16.msra.mxu1 %v2775_v43  ;;  %1685 = vmatprep.subr.bf16.mxu0 %v2776_v44  ;;  %v2842_v26 = vld [vmem:[#allocation5 + $0x444] ss:$16 sps:$4 sm:$0xff]   ;;  %v2840_v28 = vld [vmem:[#allocation5 + $0x440] ss:$16 sps:$4 sm:$0xff]  }
  0x60   :  { %1726 = vmatprep.subr.bf16.mxu1 %v2778_v45  ;;  %v2845_v27 = vld [vmem:[#allocation5 + $0x644] ss:$16 sps:$4 sm:$0xff]   ;;  %v2843_v29 = vld [vmem:[#allocation5 + $0x640] ss:$16 sps:$4 sm:$0xff]  }
  0x61   :  { %v2848_v30 = vld [vmem:[#allocation5 + $0x424] ss:$16 sps:$4 sm:$0xff]   ;;  %v2846_v34 = vld [vmem:[#allocation5 + $0x420] ss:$16 sps:$4 sm:$0xff]  }
  0x62   :  { %1686 = vmatpush2.bf16.msra.mxu0 %v2780_v49  ;;  %v2851_v31 = vld [vmem:[#allocation5 + $0x624] ss:$16 sps:$4 sm:$0xff]   ;;  %v2849_v35 = vld [vmem:[#allocation5 + $0x620] ss:$16 sps:$4 sm:$0xff]  }
  0x63   :  { %1727 = vmatpush2.bf16.msra.mxu1 %v2781_v50  ;;  %1687 = vmatprep.subr.bf16.mxu0 %v2782_v52  ;;  %v3305_v32 = vld [vmem:[#allocation2 + $0x10] sm:$0xff] }
  0x64   :  { %1728 = vmatprep.subr.bf16.mxu1 %v2784_v53  ;;  %v3311_v36 = vcombine.high %v3305_v32, %v3305_v32  ;;  %v2854_v38 = vld [vmem:[#allocation5 + $0x404] ss:$16 sps:$4 sm:$0xff]   ;;  %v2852_v40 = vld [vmem:[#allocation5 + $0x400] ss:$16 sps:$4 sm:$0xff]  }
  0x65   :  { %v2857_v39 = vld [vmem:[#allocation5 + $0x604] ss:$16 sps:$4 sm:$0xff]   ;;  %v2855_v41 = vld [vmem:[#allocation5 + $0x600] ss:$16 sps:$4 sm:$0xff]  }
  0x66   :  { %1688 = vmatpush2.bf16.msra.mxu0 %v2786_v54  ;;  %v2860_v42 = vld [vmem:[#allocation5 + $0x5e4] ss:$16 sps:$4 sm:$0xff]   ;;  %v2858_v44 = vld [vmem:[#allocation5 + $0x5e0] ss:$16 sps:$4 sm:$0xff]  }
  0x67   :  { %1729 = vmatpush2.bf16.msra.mxu1 %v2787_v55  ;;  %1689 = vmatprep.subr.bf16.mxu0 %v2788_v56  ;;  %v2863_v43 = vld [vmem:[#allocation5 + $0x7e4] ss:$16 sps:$4 sm:$0xff]   ;;  %v2861_v45 = vld [vmem:[#allocation5 + $0x7e0] ss:$16 sps:$4 sm:$0xff]  }
  0x68   :  { %1730 = vmatprep.subr.bf16.mxu1 %v2790_v57  ;;  %v2866_v46 = vld [vmem:[#allocation5 + $0x5c4] ss:$16 sps:$4 sm:$0xff]   ;;  %v2864_v49 = vld [vmem:[#allocation5 + $0x5c0] ss:$16 sps:$4 sm:$0xff]  }
  0x69   :  { %v2869_v48 = vld [vmem:[#allocation5 + $0x7c4] ss:$16 sps:$4 sm:$0xff]   ;;  %v2867_v50 = vld [vmem:[#allocation5 + $0x7c0] ss:$16 sps:$4 sm:$0xff]  }
  0x6a   :  { %1690 = vmatpush2.bf16.msra.mxu0 %v2792_v58  ;;  %v2872_v52 = vld [vmem:[#allocation5 + $0x5a4] ss:$16 sps:$4 sm:$0xff]   ;;  %v2870_v54 = vld [vmem:[#allocation5 + $0x5a0] ss:$16 sps:$4 sm:$0xff]  }
  0x6b   :  { %1731 = vmatpush2.bf16.msra.mxu1 %v2793_v59  ;;  %1691 = vmatprep.subr.bf16.mxu0 %v2794_v60  ;;  %v2875_v53 = vld [vmem:[#allocation5 + $0x7a4] ss:$16 sps:$4 sm:$0xff]   ;;  %v2873_v55 = vld [vmem:[#allocation5 + $0x7a0] ss:$16 sps:$4 sm:$0xff]  }
  0x6c   :  { %1732 = vmatprep.subr.bf16.mxu1 %v2796_v61  ;;  %v2878_v56 = vld [vmem:[#allocation5 + $0x584] ss:$16 sps:$4 sm:$0xff]   ;;  %v2876_v58 = vld [vmem:[#allocation5 + $0x580] ss:$16 sps:$4 sm:$0xff]  }
  0x6d   :  { %v2881_v57 = vld [vmem:[#allocation5 + $0x784] ss:$16 sps:$4 sm:$0xff]   ;;  %v2879_v59 = vld [vmem:[#allocation5 + $0x780] ss:$16 sps:$4 sm:$0xff]  }
  0x6e   :  { %1692 = vmatpush2.bf16.msra.mxu0 %v2798_v62  ;;  %v2884_v60 = vld [vmem:[#allocation5 + $0x564] ss:$16 sps:$4 sm:$0xff]   ;;  %v2882_v62 = vld [vmem:[#allocation5 + $0x560] ss:$16 sps:$4 sm:$0xff]  }
  0x6f   :  { %1733 = vmatpush2.bf16.msra.mxu1 %v2799_v63  ;;  %1693 = vmatprep.subr.bf16.mxu0 %v2800_v0  ;;  %v2887_v61 = vld [vmem:[#allocation5 + $0x764] ss:$16 sps:$4 sm:$0xff]   ;;  %v2885_v63 = vld [vmem:[#allocation5 + $0x760] ss:$16 sps:$4 sm:$0xff]  }
  0x70   :  { %1734 = vmatprep.subr.bf16.mxu1 %v2802_v1  ;;  %v2890_v0 = vld [vmem:[#allocation5 + $0x544] ss:$16 sps:$4 sm:$0xff]  }
  0x71   :  { %v2893_v1 = vld [vmem:[#allocation5 + $0x744] ss:$16 sps:$4 sm:$0xff]  }
  0x72   :  { %1694 = vmatpush2.bf16.msra.mxu0 %v2804_v2  ;;  %v2888_v2 = vld [vmem:[#allocation5 + $0x540] ss:$16 sps:$4 sm:$0xff]  }
  0x73   :  { %1735 = vmatpush2.bf16.msra.mxu1 %v2805_v3  ;;  %1745 = vmatprep.subr.bf16.mxu0 %v2812_v4  ;;  %v2891_v3 = vld [vmem:[#allocation5 + $0x740] ss:$16 sps:$4 sm:$0xff]   ;;  %v2896_v4 = vld [vmem:[#allocation5 + $0x524] ss:$16 sps:$4 sm:$0xff]  }
  0x74   :  { %1786 = vmatprep.subr.bf16.mxu1 %v2815_v5  ;;  %v2899_v5 = vld [vmem:[#allocation5 + $0x724] ss:$16 sps:$4 sm:$0xff]  }
  0x75   :  { %1696 = vmatmul.mubr.bf16.vlgmr.msra.gmra.mxu0 %v3299_v6 }
  0x76   :  { %1737 = vmatmul.mubr.bf16.vlgmr.msra.gmra.mxu1 %v3301_v7  ;;  %1746 = vmatpush1.bf16.msra.mxu0 %v2810_v8  ;;  %v2894_v8 = vld [vmem:[#allocation5 + $0x520] ss:$16 sps:$4 sm:$0xff]  }
  0x77   :  { %1787 = vmatpush1.bf16.msra.mxu1 %v2813_v9  ;;  %1747 = vmatprep.subr.bf16.mxu0 %v2818_v10  ;;  %v2897_v9 = vld [vmem:[#allocation5 + $0x720] ss:$16 sps:$4 sm:$0xff]   ;;  %v2902_v10 = vld [vmem:[#allocation5 + $0x504] ss:$16 sps:$4 sm:$0xff]  }
  0x78   :  { %1788 = vmatprep.subr.bf16.mxu1 %v2821_v11  ;;  %1777 = vmatprep.mubr.bf16.mxu0 %v3311_v36  ;;  %v2905_v11 = vld [vmem:[#allocation5 + $0x704] ss:$16 sps:$4 sm:$0xff]  }
  0x79   :  { %1818 = vmatprep.mubr.bf16.mxu1 %v3315_v37 }
  0x7a   :  { %1748 = vmatpush1.bf16.msra.mxu0 %v2816_v12  ;;  %v2900_v12 = vld [vmem:[#allocation5 + $0x500] ss:$16 sps:$4 sm:$0xff]  }
  0x7b   :  { %1789 = vmatpush1.bf16.msra.mxu1 %v2819_v13  ;;  %1749 = vmatprep.subr.bf16.mxu0 %v2824_v14  ;;  %v2903_v13 = vld [vmem:[#allocation5 + $0x700] ss:$16 sps:$4 sm:$0xff]   ;;  %v2912_v14 = vld [vmem:[#allocation5 + $0xec] ss:$16 sps:$4 sm:$0xff]  }
  0x7c   :  { %1790 = vmatprep.subr.bf16.mxu1 %v2827_v15  ;;  %v2915_v15 = vld [vmem:[#allocation5 + $0x2ec] ss:$16 sps:$4 sm:$0xff]  }
  0x7e   :  { %1750 = vmatpush1.bf16.msra.mxu0 %v2822_v16  ;;  %v3321_v16 = vcombine.low %v3305_v32, %v3305_v32  ;;  %v2936_v32 = vld [vmem:[#allocation5 + $0x6c] ss:$16 sps:$4 sm:$0xff]  }
  0x7f   :  { %1791 = vmatpush1.bf16.msra.mxu1 %v2825_v17  ;;  %1751 = vmatprep.subr.bf16.mxu0 %v2830_v18  ;;  %v3325_v17 = vcombine.low %v3307_v33, %v3307_v33  ;;  %v2910_v18 = vld [vmem:[#allocation5 + $0xe8] ss:$16 sps:$4 sm:$0xff]   ;;  %v2939_v33 = vld [vmem:[#allocation5 + $0x26c] ss:$16 sps:$4 sm:$0xff]  }
  0x80   :  { %1792 = vmatprep.subr.bf16.mxu1 %v2833_v19  ;;  %v2913_v19 = vld [vmem:[#allocation5 + $0x2e8] ss:$16 sps:$4 sm:$0xff]  }
  0x82   :  { %1752 = vmatpush1.bf16.msra.mxu0 %v2828_v20  ;;  %v2918_v20 = vld [vmem:[#allocation5 + $0xcc] ss:$16 sps:$4 sm:$0xff]  }
  0x83   :  { %1793 = vmatpush1.bf16.msra.mxu1 %v2831_v21  ;;  %1753 = vmatprep.subr.bf16.mxu0 %v2836_v22  ;;  %v2921_v21 = vld [vmem:[#allocation5 + $0x2cc] ss:$16 sps:$4 sm:$0xff]   ;;  %v2916_v22 = vld [vmem:[#allocation5 + $0xc8] ss:$16 sps:$4 sm:$0xff]  }
  0x84   :  { %1794 = vmatprep.subr.bf16.mxu1 %v2839_v23  ;;  %v2919_v23 = vld [vmem:[#allocation5 + $0x2c8] ss:$16 sps:$4 sm:$0xff]  }
  0x86   :  { %1754 = vmatpush1.bf16.msra.mxu0 %v2834_v24  ;;  %v2924_v24 = vld [vmem:[#allocation5 + $0xac] ss:$16 sps:$4 sm:$0xff]  }
  0x87   :  { %1795 = vmatpush1.bf16.msra.mxu1 %v2837_v25  ;;  %1755 = vmatprep.subr.bf16.mxu0 %v2842_v26  ;;  %v2927_v25 = vld [vmem:[#allocation5 + $0x2ac] ss:$16 sps:$4 sm:$0xff]   ;;  %v2922_v26 = vld [vmem:[#allocation5 + $0xa8] ss:$16 sps:$4 sm:$0xff]  }
  0x88   :  { %1796 = vmatprep.subr.bf16.mxu1 %v2845_v27  ;;  %v2925_v27 = vld [vmem:[#allocation5 + $0x2a8] ss:$16 sps:$4 sm:$0xff]  }
  0x8a   :  { %1756 = vmatpush1.bf16.msra.mxu0 %v2840_v28  ;;  %v2930_v28 = vld [vmem:[#allocation5 + $0x8c] ss:$16 sps:$4 sm:$0xff]  }
  0x8b   :  { %1797 = vmatpush1.bf16.msra.mxu1 %v2843_v29  ;;  %1757 = vmatprep.subr.bf16.mxu0 %v2848_v30  ;;  %v2933_v29 = vld [vmem:[#allocation5 + $0x28c] ss:$16 sps:$4 sm:$0xff]   ;;  %v2928_v30 = vld [vmem:[#allocation5 + $0x88] ss:$16 sps:$4 sm:$0xff]  }
  0x8c   :  { %1798 = vmatprep.subr.bf16.mxu1 %v2851_v31  ;;  %v2931_v31 = vld [vmem:[#allocation5 + $0x288] ss:$16 sps:$4 sm:$0xff]  }
  0x8e   :  { %1758 = vmatpush1.bf16.msra.mxu0 %v2846_v34  ;;  %v2934_v34 = vld [vmem:[#allocation5 + $0x68] ss:$16 sps:$4 sm:$0xff]  }
  0x8f   :  { %1799 = vmatpush1.bf16.msra.mxu1 %v2849_v35  ;;  %1759 = vmatprep.subr.bf16.mxu0 %v2854_v38  ;;  %v2945_v35 = vld [vmem:[#allocation5 + $0x24c] ss:$16 sps:$4 sm:$0xff]   ;;  %v2940_v38 = vld [vmem:[#allocation5 + $0x48] ss:$16 sps:$4 sm:$0xff]  }
  0x90   :  { %1800 = vmatprep.subr.bf16.mxu1 %v2857_v39  ;;  %v2943_v39 = vld [vmem:[#allocation5 + $0x248] ss:$16 sps:$4 sm:$0xff]  }
  0x92   :  { %1760 = vmatpush1.bf16.msra.mxu0 %v2852_v40  ;;  %v2948_v40 = vld [vmem:[#allocation5 + $0x2c] ss:$16 sps:$4 sm:$0xff]  }
  0x93   :  { %1801 = vmatpush1.bf16.msra.mxu1 %v2855_v41  ;;  %1761 = vmatprep.subr.bf16.mxu0 %v2860_v42  ;;  %v2951_v41 = vld [vmem:[#allocation5 + $0x22c] ss:$16 sps:$4 sm:$0xff]   ;;  %v2946_v42 = vld [vmem:[#allocation5 + $0x28] ss:$16 sps:$4 sm:$0xff]  }
  0x94   :  { %1802 = vmatprep.subr.bf16.mxu1 %v2863_v43  ;;  %v2949_v43 = vld [vmem:[#allocation5 + $0x228] ss:$16 sps:$4 sm:$0xff]  }
  0x96   :  { %1762 = vmatpush2.bf16.msra.mxu0 %v2858_v44  ;;  %v2954_v44 = vld [vmem:[#allocation5 + $0xc] ss:$16 sps:$4 sm:$0xff]  }
  0x97   :  { %1803 = vmatpush2.bf16.msra.mxu1 %v2861_v45  ;;  %1763 = vmatprep.subr.bf16.mxu0 %v2866_v46  ;;  %v2957_v45 = vld [vmem:[#allocation5 + $0x20c] ss:$16 sps:$4 sm:$0xff]   ;;  %v2952_v46 = vld [vmem:[#allocation5 + $0x8] ss:$16 sps:$4 sm:$0xff]  }
  0x98   :  { %1804 = vmatprep.subr.bf16.mxu1 %v2869_v48  ;;  %v2955_v48 = vld [vmem:[#allocation5 + $0x208] ss:$16 sps:$4 sm:$0xff]  }
  0x9a   :  { %1764 = vmatpush2.bf16.msra.mxu0 %v2864_v49  ;;  %v2960_v49 = vld [vmem:[#allocation5 + $0x1ec] ss:$16 sps:$4 sm:$0xff]  }
  0x9b   :  { %1805 = vmatpush2.bf16.msra.mxu1 %v2867_v50  ;;  %1765 = vmatprep.subr.bf16.mxu0 %v2872_v52  ;;  %v2963_v50 = vld [vmem:[#allocation5 + $0x3ec] ss:$16 sps:$4 sm:$0xff]   ;;  %v2958_v52 = vld [vmem:[#allocation5 + $0x1e8] ss:$16 sps:$4 sm:$0xff]  }
  0x9c   :  { %1806 = vmatprep.subr.bf16.mxu1 %v2875_v53  ;;  %v2961_v53 = vld [vmem:[#allocation5 + $0x3e8] ss:$16 sps:$4 sm:$0xff]  }
  0x9e   :  { %1766 = vmatpush2.bf16.msra.mxu0 %v2870_v54  ;;  %v2966_v54 = vld [vmem:[#allocation5 + $0x1cc] ss:$16 sps:$4 sm:$0xff]  }
  0x9f   :  { %1807 = vmatpush2.bf16.msra.mxu1 %v2873_v55  ;;  %1767 = vmatprep.subr.bf16.mxu0 %v2878_v56  ;;  %v2969_v55 = vld [vmem:[#allocation5 + $0x3cc] ss:$16 sps:$4 sm:$0xff]   ;;  %v2964_v56 = vld [vmem:[#allocation5 + $0x1c8] ss:$16 sps:$4 sm:$0xff]  }
  0xa0   :  { %1808 = vmatprep.subr.bf16.mxu1 %v2881_v57  ;;  %v2967_v57 = vld [vmem:[#allocation5 + $0x3c8] ss:$16 sps:$4 sm:$0xff]  }
  0xa2   :  { %1768 = vmatpush2.bf16.msra.mxu0 %v2876_v58  ;;  %v2972_v58 = vld [vmem:[#allocation5 + $0x1ac] ss:$16 sps:$4 sm:$0xff]  }
  0xa3   :  { %1809 = vmatpush2.bf16.msra.mxu1 %v2879_v59  ;;  %1769 = vmatprep.subr.bf16.mxu0 %v2884_v60  ;;  %v2975_v59 = vld [vmem:[#allocation5 + $0x3ac] ss:$16 sps:$4 sm:$0xff]   ;;  %v2970_v60 = vld [vmem:[#allocation5 + $0x1a8] ss:$16 sps:$4 sm:$0xff]  }
  0xa4   :  { %1810 = vmatprep.subr.bf16.mxu1 %v2887_v61  ;;  %v2973_v61 = vld [vmem:[#allocation5 + $0x3a8] ss:$16 sps:$4 sm:$0xff]  }
  0xa6   :  { %1770 = vmatpush2.bf16.msra.mxu0 %v2882_v62  ;;  %v2978_v62 = vld [vmem:[#allocation5 + $0x18c] ss:$16 sps:$4 sm:$0xff]  }
  0xa7   :  { %1811 = vmatpush2.bf16.msra.mxu1 %v2885_v63  ;;  %1771 = vmatprep.subr.bf16.mxu0 %v2890_v0  ;;  %v2981_v63 = vld [vmem:[#allocation5 + $0x38c] ss:$16 sps:$4 sm:$0xff]   ;;  %v2976_v0 = vld [vmem:[#allocation5 + $0x188] ss:$16 sps:$4 sm:$0xff]  }
  0xa8   :  { %1812 = vmatprep.subr.bf16.mxu1 %v2893_v1  ;;  %v2979_v1 = vld [vmem:[#allocation5 + $0x388] ss:$16 sps:$4 sm:$0xff]  }
  0xaa   :  { %1772 = vmatpush2.bf16.msra.mxu0 %v2888_v2  ;;  %v2984_v2 = vld [vmem:[#allocation5 + $0x16c] ss:$16 sps:$4 sm:$0xff]  }
  0xab   :  { %1813 = vmatpush2.bf16.msra.mxu1 %v2891_v3  ;;  %1773 = vmatprep.subr.bf16.mxu0 %v2896_v4  ;;  %v2987_v3 = vld [vmem:[#allocation5 + $0x36c] ss:$16 sps:$4 sm:$0xff]   ;;  %v2982_v4 = vld [vmem:[#allocation5 + $0x168] ss:$16 sps:$4 sm:$0xff]  }
  0xac   :  { %1814 = vmatprep.subr.bf16.mxu1 %v2899_v5  ;;  %v2985_v5 = vld [vmem:[#allocation5 + $0x368] ss:$16 sps:$4 sm:$0xff]  }
  0xae   :  { %1774 = vmatpush2.bf16.msra.mxu0 %v2894_v8  ;;  %v2990_v8 = vld [vmem:[#allocation5 + $0x14c] ss:$16 sps:$4 sm:$0xff]  }
  0xaf   :  { %1815 = vmatpush2.bf16.msra.mxu1 %v2897_v9  ;;  %1775 = vmatprep.subr.bf16.mxu0 %v2902_v10  ;;  %v2993_v9 = vld [vmem:[#allocation5 + $0x34c] ss:$16 sps:$4 sm:$0xff]   ;;  %v2988_v10 = vld [vmem:[#allocation5 + $0x148] ss:$16 sps:$4 sm:$0xff]  }
  0xb0   :  { %1816 = vmatprep.subr.bf16.mxu1 %v2905_v11  ;;  %v2991_v11 = vld [vmem:[#allocation5 + $0x348] ss:$16 sps:$4 sm:$0xff]  }
  0xb2   :  { %1776 = vmatpush2.bf16.msra.mxu0 %v2900_v12  ;;  %v2996_v12 = vld [vmem:[#allocation5 + $0x12c] ss:$16 sps:$4 sm:$0xff]  }
  0xb3   :  { %1817 = vmatpush2.bf16.msra.mxu1 %v2903_v13  ;;  %1827 = vmatprep.subr.bf16.mxu0 %v2912_v14  ;;  %v2999_v13 = vld [vmem:[#allocation5 + $0x32c] ss:$16 sps:$4 sm:$0xff]   ;;  %v2994_v14 = vld [vmem:[#allocation5 + $0x128] ss:$16 sps:$4 sm:$0xff]  }
  0xb4   :  { %1868 = vmatprep.subr.bf16.mxu1 %v2915_v15  ;;  %v2997_v15 = vld [vmem:[#allocation5 + $0x328] ss:$16 sps:$4 sm:$0xff]  }
  0xb5   :  { %1778 = vmatmul.mubr.bf16.vlgmr.msra.gmra.mxu0 %v3321_v16 }
  0xb6   :  { %1819 = vmatmul.mubr.bf16.vlgmr.msra.gmra.mxu1 %v3325_v17  ;;  %1828 = vmatpush1.bf16.msra.mxu0 %v2910_v18  ;;  %v3002_v18 = vld [vmem:[#allocation5 + $0x10c] ss:$16 sps:$4 sm:$0xff]  }
  0xb7   :  { %1869 = vmatpush1.bf16.msra.mxu1 %v2913_v19  ;;  %1829 = vmatprep.subr.bf16.mxu0 %v2918_v20  ;;  %v3005_v19 = vld [vmem:[#allocation5 + $0x30c] ss:$16 sps:$4 sm:$0xff]   ;;  %v3000_v20 = vld [vmem:[#allocation5 + $0x108] ss:$16 sps:$4 sm:$0xff]  }
  0xb8   :  { %1870 = vmatprep.subr.bf16.mxu1 %v2921_v21  ;;  %1859 = vmatprep.mubr.bf16.mxu0 %v3293_v47  ;;  %v2937_v47 = vld [vmem:[#allocation5 + $0x268] ss:$16 sps:$4 sm:$0xff]  }
  0xb9   :  { %1900 = vmatprep.mubr.bf16.mxu1 %v3295_v51  ;;  %v2942_v51 = vld [vmem:[#allocation5 + $0x4c] ss:$16 sps:$4 sm:$0xff]   ;;  %v3003_v21 = vld [vmem:[#allocation5 + $0x308] ss:$16 sps:$4 sm:$0xff]  }
  0xba   :  { %1830 = vmatpush1.bf16.msra.mxu0 %v2916_v22  ;;  %v3008_v22 = vld [vmem:[#allocation5 + $0x4ec] ss:$16 sps:$4 sm:$0xff]  }
  0xbb   :  { %1871 = vmatpush1.bf16.msra.mxu1 %v2919_v23  ;;  %1831 = vmatprep.subr.bf16.mxu0 %v2924_v24  ;;  %v3011_v23 = vld [vmem:[#allocation5 + $0x6ec] ss:$16 sps:$4 sm:$0xff]   ;;  %v3006_v24 = vld [vmem:[#allocation5 + $0x4e8] ss:$16 sps:$4 sm:$0xff]  }
  0xbc   :  { %1872 = vmatprep.subr.bf16.mxu1 %v2927_v25  ;;  %v3009_v25 = vld [vmem:[#allocation5 + $0x6e8] ss:$16 sps:$4 sm:$0xff]  }
  0xbe   :  { %1832 = vmatpush1.bf16.msra.mxu0 %v2922_v26  ;;  %v3014_v26 = vld [vmem:[#allocation5 + $0x4cc] ss:$16 sps:$4 sm:$0xff]  }
  0xbf   :  { %1873 = vmatpush1.bf16.msra.mxu1 %v2925_v27  ;;  %1833 = vmatprep.subr.bf16.mxu0 %v2930_v28  ;;  %v3017_v27 = vld [vmem:[#allocation5 + $0x6cc] ss:$16 sps:$4 sm:$0xff]   ;;  %v3012_v28 = vld [vmem:[#allocation5 + $0x4c8] ss:$16 sps:$4 sm:$0xff]  }
  0xc0   :  { %1874 = vmatprep.subr.bf16.mxu1 %v2933_v29  ;;  %v3015_v29 = vld [vmem:[#allocation5 + $0x6c8] ss:$16 sps:$4 sm:$0xff]  }
  0xc2   :  { %1834 = vmatpush1.bf16.msra.mxu0 %v2928_v30  ;;  %v3020_v30 = vld [vmem:[#allocation5 + $0x4ac] ss:$16 sps:$4 sm:$0xff]  }
  0xc3   :  { %1875 = vmatpush1.bf16.msra.mxu1 %v2931_v31  ;;  %1835 = vmatprep.subr.bf16.mxu0 %v2936_v32  ;;  %v3023_v31 = vld [vmem:[#allocation5 + $0x6ac] ss:$16 sps:$4 sm:$0xff]   ;;  %v3018_v32 = vld [vmem:[#allocation5 + $0x4a8] ss:$16 sps:$4 sm:$0xff]  }
  0xc4   :  { %1876 = vmatprep.subr.bf16.mxu1 %v2939_v33  ;;  %v3021_v33 = vld [vmem:[#allocation5 + $0x6a8] ss:$16 sps:$4 sm:$0xff]  }
  0xc6   :  { %1836 = vmatpush1.bf16.msra.mxu0 %v2934_v34  ;;  %v3026_v34 = vld [vmem:[#allocation5 + $0x48c] ss:$16 sps:$4 sm:$0xff]  }
  0xc7   :  { %1877 = vmatpush1.bf16.msra.mxu1 %v2937_v47  ;;  %1837 = vmatprep.subr.bf16.mxu0 %v2942_v51  ;;  %v3027_v47 = vld [vmem:[#allocation5 + $0x688] ss:$16 sps:$4 sm:$0xff]   ;;  %v3032_v51 = vld [vmem:[#allocation5 + $0x46c] ss:$16 sps:$4 sm:$0xff]  }
  0xc8   :  { %1878 = vmatprep.subr.bf16.mxu1 %v2945_v35  ;;  %v3035_v35 = vld [vmem:[#allocation5 + $0x66c] ss:$16 sps:$4 sm:$0xff]  }
  0xca   :  { %1838 = vmatpush1.bf16.msra.mxu0 %v2940_v38  ;;  %v3038_v38 = vld [vmem:[#allocation5 + $0x44c] ss:$16 sps:$4 sm:$0xff]  }
  0xcb   :  { %1879 = vmatpush1.bf16.msra.mxu1 %v2943_v39  ;;  %1839 = vmatprep.subr.bf16.mxu0 %v2948_v40  ;;  %v3041_v39 = vld [vmem:[#allocation5 + $0x64c] ss:$16 sps:$4 sm:$0xff]   ;;  %v3036_v40 = vld [vmem:[#allocation5 + $0x448] ss:$16 sps:$4 sm:$0xff]  }
  0xcc   :  { %1880 = vmatprep.subr.bf16.mxu1 %v2951_v41  ;;  %v3039_v41 = vld [vmem:[#allocation5 + $0x648] ss:$16 sps:$4 sm:$0xff]  }
  0xce   :  { %1840 = vmatpush1.bf16.msra.mxu0 %v2946_v42  ;;  %v3044_v42 = vld [vmem:[#allocation5 + $0x42c] ss:$16 sps:$4 sm:$0xff]  }
  0xcf   :  { %1881 = vmatpush1.bf16.msra.mxu1 %v2949_v43  ;;  %1841 = vmatprep.subr.bf16.mxu0 %v2954_v44  ;;  %v3047_v43 = vld [vmem:[#allocation5 + $0x62c] ss:$16 sps:$4 sm:$0xff]   ;;  %v3042_v44 = vld [vmem:[#allocation5 + $0x428] ss:$16 sps:$4 sm:$0xff]  }
  0xd0   :  { %1882 = vmatprep.subr.bf16.mxu1 %v2957_v45  ;;  %v3045_v45 = vld [vmem:[#allocation5 + $0x628] ss:$16 sps:$4 sm:$0xff]  }
  0xd2   :  { %1842 = vmatpush1.bf16.msra.mxu0 %v2952_v46  ;;  %v3050_v46 = vld [vmem:[#allocation5 + $0x40c] ss:$16 sps:$4 sm:$0xff]  }
  0xd3   :  { %1883 = vmatpush1.bf16.msra.mxu1 %v2955_v48  ;;  %1843 = vmatprep.subr.bf16.mxu0 %v2960_v49  ;;  %v3053_v48 = vld [vmem:[#allocation5 + $0x60c] ss:$16 sps:$4 sm:$0xff]   ;;  %v3048_v49 = vld [vmem:[#allocation5 + $0x408] ss:$16 sps:$4 sm:$0xff]  }
  0xd4   :  { %1884 = vmatprep.subr.bf16.mxu1 %v2963_v50  ;;  %v3051_v50 = vld [vmem:[#allocation5 + $0x608] ss:$16 sps:$4 sm:$0xff]  }
  0xd6   :  { %1844 = vmatpush2.bf16.msra.mxu0 %v2958_v52  ;;  %v3056_v52 = vld [vmem:[#allocation5 + $0x5ec] ss:$16 sps:$4 sm:$0xff]  }
  0xd7   :  { %1885 = vmatpush2.bf16.msra.mxu1 %v2961_v53  ;;  %1845 = vmatprep.subr.bf16.mxu0 %v2966_v54  ;;  %v3059_v53 = vld [vmem:[#allocation5 + $0x7ec] ss:$16 sps:$4 sm:$0xff]   ;;  %v3054_v54 = vld [vmem:[#allocation5 + $0x5e8] ss:$16 sps:$4 sm:$0xff]  }
  0xd8   :  { %1886 = vmatprep.subr.bf16.mxu1 %v2969_v55  ;;  %v3057_v55 = vld [vmem:[#allocation5 + $0x7e8] ss:$16 sps:$4 sm:$0xff]  }
  0xda   :  { %1846 = vmatpush2.bf16.msra.mxu0 %v2964_v56  ;;  %v3062_v56 = vld [vmem:[#allocation5 + $0x5cc] ss:$16 sps:$4 sm:$0xff]  }
  0xdb   :  { %1887 = vmatpush2.bf16.msra.mxu1 %v2967_v57  ;;  %1847 = vmatprep.subr.bf16.mxu0 %v2972_v58  ;;  %v3065_v57 = vld [vmem:[#allocation5 + $0x7cc] ss:$16 sps:$4 sm:$0xff]   ;;  %v3060_v58 = vld [vmem:[#allocation5 + $0x5c8] ss:$16 sps:$4 sm:$0xff]  }
  0xdc   :  { %1888 = vmatprep.subr.bf16.mxu1 %v2975_v59  ;;  %v3063_v59 = vld [vmem:[#allocation5 + $0x7c8] ss:$16 sps:$4 sm:$0xff]  }
  0xde   :  { %1848 = vmatpush2.bf16.msra.mxu0 %v2970_v60  ;;  %v3068_v60 = vld [vmem:[#allocation5 + $0x5ac] ss:$16 sps:$4 sm:$0xff]  }
  0xdf   :  { %1889 = vmatpush2.bf16.msra.mxu1 %v2973_v61  ;;  %1849 = vmatprep.subr.bf16.mxu0 %v2978_v62  ;;  %v3071_v61 = vld [vmem:[#allocation5 + $0x7ac] ss:$16 sps:$4 sm:$0xff]   ;;  %v3066_v62 = vld [vmem:[#allocation5 + $0x5a8] ss:$16 sps:$4 sm:$0xff]  }
  0xe0   :  { %1890 = vmatprep.subr.bf16.mxu1 %v2981_v63  ;;  %v3069_v63 = vld [vmem:[#allocation5 + $0x7a8] ss:$16 sps:$4 sm:$0xff]  }
  0xe2   :  { %1850 = vmatpush2.bf16.msra.mxu0 %v2976_v0  ;;  %v3074_v0 = vld [vmem:[#allocation5 + $0x58c] ss:$16 sps:$4 sm:$0xff]  }
  0xe3   :  { %1891 = vmatpush2.bf16.msra.mxu1 %v2979_v1  ;;  %1851 = vmatprep.subr.bf16.mxu0 %v2984_v2  ;;  %v3077_v1 = vld [vmem:[#allocation5 + $0x78c] ss:$16 sps:$4 sm:$0xff]   ;;  %v3072_v2 = vld [vmem:[#allocation5 + $0x588] ss:$16 sps:$4 sm:$0xff]  }
  0xe4   :  { %1892 = vmatprep.subr.bf16.mxu1 %v2987_v3  ;;  %v3075_v3 = vld [vmem:[#allocation5 + $0x788] ss:$16 sps:$4 sm:$0xff]  }
  0xe6   :  { %1852 = vmatpush2.bf16.msra.mxu0 %v2982_v4  ;;  %v3080_v4 = vld [vmem:[#allocation5 + $0x56c] ss:$16 sps:$4 sm:$0xff]  }
  0xe7   :  { %1893 = vmatpush2.bf16.msra.mxu1 %v2985_v5  ;;  %1853 = vmatprep.subr.bf16.mxu0 %v2990_v8  ;;  %v3083_v5 = vld [vmem:[#allocation5 + $0x76c] ss:$16 sps:$4 sm:$0xff]   ;;  %v3078_v8 = vld [vmem:[#allocation5 + $0x568] ss:$16 sps:$4 sm:$0xff]  }
  0xe8   :  { %1894 = vmatprep.subr.bf16.mxu1 %v2993_v9  ;;  %v3081_v9 = vld [vmem:[#allocation5 + $0x768] ss:$16 sps:$4 sm:$0xff]  }
  0xea   :  { %1854 = vmatpush2.bf16.msra.mxu0 %v2988_v10  ;;  %v3086_v10 = vld [vmem:[#allocation5 + $0x54c] ss:$16 sps:$4 sm:$0xff]  }
  0xeb   :  { %1895 = vmatpush2.bf16.msra.mxu1 %v2991_v11  ;;  %1855 = vmatprep.subr.bf16.mxu0 %v2996_v12  ;;  %v3089_v11 = vld [vmem:[#allocation5 + $0x74c] ss:$16 sps:$4 sm:$0xff]   ;;  %v3084_v12 = vld [vmem:[#allocation5 + $0x548] ss:$16 sps:$4 sm:$0xff]  }
  0xec   :  { %1896 = vmatprep.subr.bf16.mxu1 %v2999_v13  ;;  %v3087_v13 = vld [vmem:[#allocation5 + $0x748] ss:$16 sps:$4 sm:$0xff]  }
  0xee   :  { %1856 = vmatpush2.bf16.msra.mxu0 %v2994_v14  ;;  %v3092_v14 = vld [vmem:[#allocation5 + $0x52c] ss:$16 sps:$4 sm:$0xff]  }
  0xef   :  { %1897 = vmatpush2.bf16.msra.mxu1 %v2997_v15  ;;  %1857 = vmatprep.subr.bf16.mxu0 %v3002_v18  ;;  %v3095_v15 = vld [vmem:[#allocation5 + $0x72c] ss:$16 sps:$4 sm:$0xff]   ;;  %v3090_v18 = vld [vmem:[#allocation5 + $0x528] ss:$16 sps:$4 sm:$0xff]  }
  0xf0   :  { %1898 = vmatprep.subr.bf16.mxu1 %v3005_v19  ;;  %v3093_v19 = vld [vmem:[#allocation5 + $0x728] ss:$16 sps:$4 sm:$0xff]  }
  0xf2   :  { %1858 = vmatpush2.bf16.msra.mxu0 %v3000_v20  ;;  %v3098_v20 = vld [vmem:[#allocation5 + $0x50c] ss:$16 sps:$4 sm:$0xff]  }
  0xf3   :  { %1899 = vmatpush2.bf16.msra.mxu1 %v3003_v21  ;;  %1909 = vmatprep.subr.bf16.mxu0 %v3008_v22  ;;  %v3101_v21 = vld [vmem:[#allocation5 + $0x70c] ss:$16 sps:$4 sm:$0xff]   ;;  %v3096_v22 = vld [vmem:[#allocation5 + $0x508] ss:$16 sps:$4 sm:$0xff]  }
  0xf4   :  { %1950 = vmatprep.subr.bf16.mxu1 %v3011_v23  ;;  %v3099_v23 = vld [vmem:[#allocation5 + $0x708] ss:$16 sps:$4 sm:$0xff]  }
  0xf5   :  { %1860 = vmatmul.mubr.bf16.vlgmr.msra.gmra.mxu0 %v3299_v6  ;;  %v3029_v6 = vld [vmem:[#allocation5 + $0x68c] ss:$16 sps:$4 sm:$0xff]  }
  0xf6   :  { %1901 = vmatmul.mubr.bf16.vlgmr.msra.gmra.mxu1 %v3301_v7  ;;  %1910 = vmatpush1.bf16.msra.mxu0 %v3006_v24  ;;  %v3024_v7 = vld [vmem:[#allocation5 + $0x488] ss:$16 sps:$4 sm:$0xff]   ;;  %v3102_v24 = vld [vmem:[#allocation8 + $0x78] sm:$0xff]  }
  0xf7   :  { %1951 = vmatpush1.bf16.msra.mxu1 %v3009_v25  ;;  %1911 = vmatprep.subr.bf16.mxu0 %v3014_v26  ;;  %v3103_v25 = vld [vmem:[#allocation8 + $0x38] sm:$0xff]   ;;  %v3104_v26 = vld [vmem:[#allocation8 + $0x70] sm:$0xff]  }
  0xf8   :  { %1952 = vmatprep.subr.bf16.mxu1 %v3017_v27  ;;  %1941 = vmatprep.mubr.bf16.mxu0 %v3311_v36  ;;  %v3030_v36 = vld [vmem:[#allocation5 + $0x468] ss:$16 sps:$4 sm:$0xff]  }
  0xf9   :  { %1982 = vmatprep.mubr.bf16.mxu1 %v3315_v37  ;;  %v3033_v37 = vld [vmem:[#allocation5 + $0x668] ss:$16 sps:$4 sm:$0xff]  }
  0xfa   :  { %1912 = vmatpush1.bf16.msra.mxu0 %v3012_v28 }
  0xfb   :  { %1953 = vmatpush1.bf16.msra.mxu1 %v3015_v29  ;;  %1913 = vmatprep.subr.bf16.mxu0 %v3020_v30  ;;  %v3105_v29 = vld [vmem:[#allocation8 + $0x30] sm:$0xff]  }
  0xfc   :  { %1954 = vmatprep.subr.bf16.mxu1 %v3023_v31 }
  0xfe   :  { %1914 = vmatpush1.bf16.msra.mxu0 %v3018_v32  ;;  %v3106_v32 = vld [vmem:[#allocation8 + $0x68] sm:$0xff]  }
  0xff   :  { %1955 = vmatpush1.bf16.msra.mxu1 %v3021_v33  ;;  %1915 = vmatprep.subr.bf16.mxu0 %v3026_v34 }
 0x100   :  { %1956 = vmatprep.subr.bf16.mxu1 %v3029_v6  ;;  %v3107_v6 = vld [vmem:[#allocation8 + $0x28] sm:$0xff]  }
 0x102   :  { %1916 = vmatpush1.bf16.msra.mxu0 %v3024_v7  ;;  %v3108_v7 = vld [vmem:[#allocation8 + $0x60] sm:$0xff]  }
 0x103   :  { %1957 = vmatpush1.bf16.msra.mxu1 %v3027_v47  ;;  %1917 = vmatprep.subr.bf16.mxu0 %v3032_v51 }
 0x104   :  { %1958 = vmatprep.subr.bf16.mxu1 %v3035_v35  ;;  %v3118_v35 = vld [vmem:[#allocation8 + $0xf8] sm:$0xff]  }
 0x106   :  { %1918 = vmatpush1.bf16.msra.mxu0 %v3030_v36  ;;  %v3119_v36 = vld [vmem:[#allocation8 + $0xb8] sm:$0xff]  }
 0x107   :  { %1959 = vmatpush1.bf16.msra.mxu1 %v3033_v37  ;;  %1919 = vmatprep.subr.bf16.mxu0 %v3038_v38  ;;  %v3121_v37 = vld [vmem:[#allocation8 + $0xb0] sm:$0xff]   ;;  %v3110_v38 = vld [vmem:[#allocation8 + $0x58] sm:$0xff]  }
 0x108   :  { %1960 = vmatprep.subr.bf16.mxu1 %v3041_v39  ;;  %v3122_v39 = vld [vmem:[#allocation8 + $0xe8] sm:$0xff]  }
 0x10a   :  { %1920 = vmatpush1.bf16.msra.mxu0 %v3036_v40  ;;  %v3111_v40 = vld [vmem:[#allocation8 + $0x18] sm:$0xff]  }
 0x10b   :  { %1961 = vmatpush1.bf16.msra.mxu1 %v3039_v41  ;;  %1921 = vmatprep.subr.bf16.mxu0 %v3044_v42  ;;  %v3123_v41 = vld [vmem:[#allocation8 + $0xa8] sm:$0xff]   ;;  %v3112_v42 = vld [vmem:[#allocation8 + $0x50] sm:$0xff]  }
 0x10c   :  { %1962 = vmatprep.subr.bf16.mxu1 %v3047_v43  ;;  %v3124_v43 = vld [vmem:[#allocation8 + $0xe0] sm:$0xff]  }
 0x10e   :  { %1922 = vmatpush1.bf16.msra.mxu0 %v3042_v44  ;;  %v3113_v44 = vld [vmem:[#allocation8 + $0x10] sm:$0xff]  }
 0x10f   :  { %1963 = vmatpush1.bf16.msra.mxu1 %v3045_v45  ;;  %1923 = vmatprep.subr.bf16.mxu0 %v3050_v46  ;;  %v3125_v45 = vld [vmem:[#allocation8 + $0xa0] sm:$0xff]   ;;  %v3114_v46 = vld [vmem:[#allocation8 + $0x48] sm:$0xff]  }
 0x110   :  { %1964 = vmatprep.subr.bf16.mxu1 %v3053_v48  ;;  %v3126_v48 = vld [vmem:[#allocation8 + $0xd8] sm:$0xff]  }
 0x112   :  { %1924 = vmatpush1.bf16.msra.mxu0 %v3048_v49  ;;  %v3115_v49 = vld [vmem:[#allocation8 + $0x8] sm:$0xff]  }
 0x113   :  { %1965 = vmatpush1.bf16.msra.mxu1 %v3051_v50  ;;  %1925 = vmatprep.subr.bf16.mxu0 %v3056_v52  ;;  %v3127_v50 = vld [vmem:[#allocation8 + $0x98] sm:$0xff]   ;;  %v3116_v52 = vld [vmem:[#allocation8 + $0x40] sm:$0xff]  }
 0x114   :  { %1966 = vmatprep.subr.bf16.mxu1 %v3059_v53  ;;  %v3117_v53 = vld [vmem:[#allocation8] sm:$0xff]  }
 0x116   :  { %1926 = vmatpush2.bf16.msra.mxu0 %v3054_v54  ;;  %v335_v54 = vlaneseq }
 0x117   :  { %1967 = vmatpush2.bf16.msra.mxu1 %v3057_v55  ;;  %1927 = vmatprep.subr.bf16.mxu0 %v3062_v56 }
 0x118   :  { %1968 = vmatprep.subr.bf16.mxu1 %v3065_v57  ;;  %v336_v55 = vshrl.u32 %v335_v54, 7  ;;  %v333_v57 = vld [vmem:[#allocation7] sm:$0xf] }
 0x11a   :  { %1928 = vmatpush2.bf16.msra.mxu0 %v3060_v58  ;;  %v337_v56 = vsub.s32 0, %v336_v55  ;;  %v341_v58 = vsub.s32 1, %v336_v55 }
 0x11b   :  { %1969 = vmatpush2.bf16.msra.mxu1 %v3063_v59  ;;  %1929 = vmatprep.subr.bf16.mxu0 %v3068_v60 }
 0x11c   :  { %1970 = vmatprep.subr.bf16.mxu1 %v3071_v61  ;;  %v338_v59 = vrot.slane %v333_v57, %v337_v56  ;;  %v342_v60 = vrot.slane %v333_v57, %v341_v58 }
 0x11e   :  { %1930 = vmatpush2.bf16.msra.mxu0 %v3066_v62 }
 0x11f   :  { %1971 = vmatpush2.bf16.msra.mxu1 %v3069_v63  ;;  %1931 = vmatprep.subr.bf16.mxu0 %v3074_v0  ;;  %v3128_v63 = vld [vmem:[#allocation8 + $0xd0] sm:$0xff]  }
 0x120   :  { %1972 = vmatprep.subr.bf16.mxu1 %v3077_v1  ;;  %v3129_v1 = vld [vmem:[#allocation8 + $0x90] sm:$0xff]  }
 0x122   :  { %1932 = vmatpush2.bf16.msra.mxu0 %v3072_v2 }
 0x123   :  { %1973 = vmatpush2.bf16.msra.mxu1 %v3075_v3  ;;  %1933 = vmatprep.subr.bf16.mxu0 %v3080_v4 }
 0x124   :  { %1974 = vmatprep.subr.bf16.mxu1 %v3083_v5 }
 0x126   :  { %1934 = vmatpush2.bf16.msra.mxu0 %v3078_v8 }
 0x127   :  { %1975 = vmatpush2.bf16.msra.mxu1 %v3081_v9  ;;  %1935 = vmatprep.subr.bf16.mxu0 %v3086_v10  ;;  %v3130_v10 = vld [vmem:[#allocation8 + $0xc8] sm:$0xff]  }
 0x128   :  { %1976 = vmatprep.subr.bf16.mxu1 %v3089_v11 }
 0x12a   :  { %1936 = vmatpush2.bf16.msra.mxu0 %v3084_v12 }
 0x12b   :  { %1977 = vmatpush2.bf16.msra.mxu1 %v3087_v13  ;;  %1937 = vmatprep.subr.bf16.mxu0 %v3092_v14  ;;  %v3131_v13 = vld [vmem:[#allocation8 + $0x88] sm:$0xff]  }
 0x12c   :  { %1978 = vmatprep.subr.bf16.mxu1 %v3095_v15 }
 0x12e   :  { %1938 = vmatpush2.bf16.msra.mxu0 %v3090_v18 }
 0x12f   :  { %1979 = vmatpush2.bf16.msra.mxu1 %v3093_v19  ;;  %1939 = vmatprep.subr.bf16.mxu0 %v3098_v20 }
 0x130   :  { %1980 = vmatprep.subr.bf16.mxu1 %v3101_v21 }
 0x132   :  { %1940 = vmatpush2.bf16.msra.mxu0 %v3096_v22  ;;  %v3132_v22 = vld [vmem:[#allocation8 + $0xc0] sm:$0xff]  }
 0x133   :  { %1981 = vmatpush2.bf16.msra.mxu1 %v3099_v23  ;;  %2657 = vmatprep.subr.bf16.mxu0 %v3102_v24  ;;  %v3133_v24 = vld [vmem:[#allocation8 + $0x80] sm:$0xff]  }
 0x134   :  { %2679 = vmatprep.subr.bf16.mxu1 %v3118_v35 }
 0x135   :  { %v3335_v27 = vpop.f32.mrf.mxu0  ;;  %1942 = vmatmul.mubr.bf16.vlgmr.msra.gmra.mxu0 %v3321_v16  ;;  %v3120_v16 = vld [vmem:[#allocation8 + $0xf0] sm:$0xff]  }
 0x136   :  { %v3337_v28 = vpop.f32.mrf.mxu1  ;;  %1983 = vmatmul.mubr.bf16.vlgmr.msra.gmra.mxu1 %v3325_v17  ;;  %2658 = vmatpush3.bf16.msra.mxu0 %v3103_v25  ;;  %v3109_v17 = vld [vmem:[#allocation8 + $0x20] sm:$0xff]   ;;  %v1698_v61 = vadd.f32 %v3335_v27, %v338_v59 }
 0x137   :  { %v1699_v30 = vpop.f32.mrf.mxu0  ;;  %2659 = vmatprep.subr.bf16.mxu0 %v3104_v26  ;;  %2680 = vmatpush3.bf16.msra.mxu1 %v3119_v36 }
 0x138   :  { %v3341_v31 = vpop.f32.mrf.mxu1  ;;  %2681 = vmatprep.subr.bf16.mxu1 %v3120_v16  ;;  %v1700_v62 = vadd.f32 %v1699_v30, %v342_v60  ;;  %v1739_v0 = vadd.f32 %v3337_v28, %v1698_v61  ;;  %v2624_v60 = vld [vmem:[%s3356_s4] ss:$0 sm:$0xff] }
 0x139   :  { %v1701_v33 = vpop.f32.mrf.mxu0 }
 0x13a   :  { %v1742_v34 = vpop.f32.mrf.mxu1  ;;  %2660 = vmatpush3.bf16.msra.mxu0 %v3105_v29  ;;  %v1741_v4 = vadd.f32 %v3341_v31, %v1700_v62 }
 0x13b   :  { %v1702_v47 = vpop.f32.mrf.mxu0  ;;  %2661 = vmatprep.subr.bf16.mxu0 %v3106_v32  ;;  %2682 = vmatpush3.bf16.msra.mxu1 %v3121_v37 }
 0x13c   :  { %v1743_v51 = vpop.f32.mrf.mxu1  ;;  %2683 = vmatprep.subr.bf16.mxu1 %v3122_v39 }
 0x13e   :  { %2662 = vmatpush3.bf16.msra.mxu0 %v3107_v6  ;;  %v345_v6 = vsub.s32 2, %v336_v55 }
 0x13f   :  { %2663 = vmatprep.subr.bf16.mxu0 %v3108_v7  ;;  %2684 = vmatpush3.bf16.msra.mxu1 %v3123_v41  ;;  %v349_v7 = vsub.s32 3, %v336_v55 }
 0x140   :  { %2685 = vmatprep.subr.bf16.mxu1 %v3124_v43  ;;  %v346_v47 = vrot.slane %v333_v57, %v345_v6 }
 0x141   :  { %v350_v51 = vrot.slane %v333_v57, %v349_v7 }
 0x142   :  { %2664 = vmatpush3.bf16.msra.mxu0 %v3109_v17 }
 0x143   :  { %2665 = vmatprep.subr.bf16.mxu0 %v3110_v38  ;;  %2686 = vmatpush3.bf16.msra.mxu1 %v3125_v45 }
 0x144   :  { %2687 = vmatprep.subr.bf16.mxu1 %v3126_v48 }
 0x146   :  { %2666 = vmatpush3.bf16.msra.mxu0 %v3111_v40 }
 0x147   :  { %2667 = vmatprep.subr.bf16.mxu0 %v3112_v42  ;;  %2688 = vmatpush3.bf16.msra.mxu1 %v3127_v50 }
 0x148   :  { %2689 = vmatprep.subr.bf16.mxu1 %v3128_v63 }
 0x14a   :  { %2668 = vmatpush3.bf16.msra.mxu0 %v3113_v44 }
 0x14b   :  { %2669 = vmatprep.subr.bf16.mxu0 %v3114_v46  ;;  %2690 = vmatpush3.bf16.msra.mxu1 %v3129_v1 }
 0x14c   :  { %2691 = vmatprep.subr.bf16.mxu1 %v3130_v10 }
 0x14e   :  { %2670 = vmatpush3.bf16.msra.mxu0 %v3115_v49 }
 0x14f   :  { %2671 = vmatprep.subr.bf16.mxu0 %v3116_v52  ;;  %2692 = vmatpush3.bf16.msra.mxu1 %v3131_v13 }
 0x150   :  { %2693 = vmatprep.subr.bf16.mxu1 %v3132_v22 }
 0x152   :  { %2672 = vmatpush3.bf16.msra.mxu0 %v3117_v53 }
 0x153   :  { %2694 = vmatpush3.bf16.msra.mxu1 %v3133_v24 }
 0x175   :  { %v1779_v2 = vpop.f32.mrf.mxu0 }
 0x176   :  { %v1820_v3 = vpop.f32.mrf.mxu1  ;;  %v1780_v5 = vadd.f32 %v1779_v2, %v1739_v0 }
 0x177   :  { %v1781_v8 = vpop.f32.mrf.mxu0 }
 0x178   :  { %v1822_v9 = vpop.f32.mrf.mxu1  ;;  %v1821_v11 = vadd.f32 %v1820_v3, %v1780_v5  ;;  %v1782_v12 = vadd.f32 %v1781_v8, %v1741_v4 }
 0x179   :  { %v1783_v14 = vpop.f32.mrf.mxu0 }
 0x17a   :  { %v1824_v15 = vpop.f32.mrf.mxu1  ;;  %v1823_v18 = vadd.f32 %v1822_v9, %v1782_v12  ;;  %v1991_v19 = vmax.f32 %v1821_v11, 0.0 }
 0x17b   :  { %v1784_v20 = vpop.f32.mrf.mxu0 }
 0x17c   :  { %v1825_v21 = vpop.f32.mrf.mxu1  ;;  %v1992_v23 = vmax.f32 %v1823_v18, 0.0  ;;  %v1995_v26 = vpack.c.bf16 %v1991_v19, %v1991_v19 }
 0x17e   :  { %v1996_v25 = vpack.c.bf16 %v1992_v23, %v1992_v23 }
 0x180   :  { %2294 = vmatprep.mubr.bf16.mxu0 %v1996_v25 }
 0x181   :  { %2295 = vmatmul.mubr.bf16.vlgmr.msra.gmra.mxu0 %v1995_v26 }
 0x1b5   :  { %v1861_v27 = vpop.f32.mrf.mxu0 }
 0x1b6   :  { %v1902_v28 = vpop.f32.mrf.mxu1  ;;  %v1862_v35 = vadd.f32 %v1861_v27, %v346_v47 }
 0x1b7   :  { %v1863_v29 = vpop.f32.mrf.mxu0 }
 0x1b8   :  { %v1904_v30 = vpop.f32.mrf.mxu1  ;;  %v1864_v36 = vadd.f32 %v1863_v29, %v350_v51  ;;  %v1903_v16 = vadd.f32 %v1902_v28, %v1862_v35 }
 0x1b9   :  { %v1865_v31 = vpop.f32.mrf.mxu0 }
 0x1ba   :  { %v1906_v32 = vpop.f32.mrf.mxu1  ;;  %v1905_v38 = vadd.f32 %v1904_v30, %v1864_v36 }
 0x1bb   :  { %v1866_v33 = vpop.f32.mrf.mxu0 }
 0x1bc   :  { %v1907_v34 = vpop.f32.mrf.mxu1 }
 0x1f5   :  { %v1943_v17 = vpop.f32.mrf.mxu0 }
 0x1f6   :  { %v1984_v37 = vpop.f32.mrf.mxu1  ;;  %v1944_v39 = vadd.f32 %v1943_v17, %v1903_v16 }
 0x1f7   :  { %v1945_v40 = vpop.f32.mrf.mxu0 }
 0x1f8   :  { %v1986_v41 = vpop.f32.mrf.mxu1  ;;  %v1985_v42 = vadd.f32 %v1984_v37, %v1944_v39  ;;  %v1946_v43 = vadd.f32 %v1945_v40, %v1905_v38 }
 0x1f9   :  { %v1947_v44 = vpop.f32.mrf.mxu0 }
 0x1fa   :  { %v1988_v45 = vpop.f32.mrf.mxu1  ;;  %v1987_v46 = vadd.f32 %v1986_v41, %v1946_v43  ;;  %v1993_v48 = vmax.f32 %v1985_v42, 0.0 }
 0x1fb   :  { %v1948_v49 = vpop.f32.mrf.mxu0 }
 0x1fc   :  { %v1989_v50 = vpop.f32.mrf.mxu1  ;;  %v1994_v52 = vmax.f32 %v1987_v46, 0.0  ;;  %v1997_v54 = vpack.c.bf16 %v1993_v48, %v1993_v48 }
 0x1fe   :  { %v1998_v53 = vpack.c.bf16 %v1994_v52, %v1994_v52 }
 0x200   :  { %2334 = vmatprep.mubr.bf16.mxu1 %v1998_v53 }
 0x201   :  { %2335 = vmatmul.mubr.bf16.vlgmr.msra.gmra.mxu1 %v1997_v54 }
 0x241   :  { %v2673_v55 = vpop.f32.mrf.mxu0 }
 0x243   :  { %v2674_v56 = vpop.f32.mrf.mxu0 }
 0x244   :  { %v2675_v57 = vadd.f32 %v2674_v56, %v2673_v55 }
 0x245   :  { %v2676_v58 = vpop.f32.mrf.mxu0 }
 0x246   :  { %v2297_v63 = vadd.f32 %v2675_v57, %v2624_v60 }
 0x247   :  { %v2677_v59 = vpop.f32.mrf.mxu0 }
 0x2c1   :  { %v2695_v61 = vpop.f32.mrf.mxu1 }
 0x2c3   :  { %v2696_v62 = vpop.f32.mrf.mxu1 }
 0x2c4   :  { %v2697_v0 = vadd.f32 %v2696_v62, %v2695_v61 }
 0x2c5   :  { %v2698_v1 = vpop.f32.mrf.mxu1 }
 0x2c6   :  { %v2337_v2 = vadd.f32 %v2697_v0, %v2297_v63 }
 0x2c7   :  { %v2699_v3 = vpop.f32.mrf.mxu1 }
 0x2c8   :  { %2342 = vst [vmem:[#allocation10] sm:$0xff] %v2337_v2 }
 0x2c9   :  { %3225 = shalt.err (!%p3222_p10)
}
 0x2ca   :  { %2352 = dma.vmem_to_hbm [thread:$0]  %s2350_s16, 128, %s3357_s5, [#allocation4]  }
 0x2cb   :  { %3240 = dma.done.wait [#allocation4], 128  }
 0x2cc   :  { %3241 = vsyncadd [#allocation4], 4294967168 }
 0x2cd   :  { %2356 = vsyncpa [#allocation3], 1 }
 0x2ce   :  { %2357 = vsyncpa [#allocation6], 1 }
 0x2cf   :  { %2358 = vsyncpa [#allocation9], 1 }
 0x2d0   :  { %2359 = vsyncpa [#allocation4], 1 }

</bundles_post_ra>
